<compile_context>
chip_gen: v5e
topology: v5e:2x2
jax: 0.10.0
libtpu: 0.0.40
codegen_flags: <defaults>
</compile_context>

<pallas_src>
import jax
import jax.numpy as jnp
from jax.experimental import pallas as pl
from jax.experimental.pallas import tpu as pltpu

IN_FEATURES = 28 * 28      # 784
OUT_FEATURES = 10
N_PAD = 128                # lane-dense padded output width
DEFAULT_TB = 2048          # max batch tile (double-buffered f32 x ~12.8 MiB)


def _linear_kernel(x_ref, w_ref, b_ref, o_ref):
    # x_ref: (TB, 784) f32   w_ref: (784, 128) bf16 (resident)
    # b_ref: (1, 128)  f32   o_ref: (TB, 128)  bf16
    x_bf = x_ref[...].astype(jnp.bfloat16)               # cast in-VMEM, not in HBM
    acc = jnp.dot(x_bf, w_ref[...], preferred_element_type=jnp.float32)
    o_ref[...] = (acc + b_ref[...]).astype(o_ref.dtype)  # bf16 writeback


def _round_up(x, m):
    return (x + m - 1) // m * m


def _choose_tiling(B, max_tb=DEFAULT_TB):
    """Balanced batch tiles: minimal padding, >=2 tiles for B>=16 (v7x megacore)."""
    if B >= 16:
        n_tiles = max(2, -(-B // max_tb))
    else:
        n_tiles = 1
    tb = _round_up(-(-B // n_tiles), 8)   # (8,128) sublane rule
    return tb, tb * n_tiles, n_tiles


def prepare_params(weight, bias):
    """One-time parameter prep (hoisted out of the per-forward path).

    weight: (10, 784) f32  ->  (784, 128) bf16, transposed + zero-padded lanes
    bias:   (10,)     f32  ->  (1, 128)   f32,  zero-padded lanes
    """
    w_t = weight.T.astype(jnp.bfloat16)                                   # (784, 10)
    w_pad = (jnp.zeros((IN_FEATURES, N_PAD), jnp.bfloat16)
             .at[:, :OUT_FEATURES].set(w_t))                              # (784, 128)
    b_pad = (jnp.zeros((1, N_PAD), jnp.float32)
             .at[0, :OUT_FEATURES].set(bias.astype(jnp.float32)))         # (1, 128)
    return w_pad, b_pad


@jax.jit
def fmnist_forward(x, w_pad, b_pad):
    """Forward pass of FMnistModel.

    x:     (B, 1, 28, 28) float32 (NCHW, like the PyTorch module)
    w_pad: (784, 128) bf16 from prepare_params
    b_pad: (1, 128)   f32  from prepare_params
    returns (B, 10) float32 logits
    """
    B = x.shape[0]
    xb = x.reshape(B, IN_FEATURES)                 # view-like bitcast; stays f32

    tb, b_padded, num_tiles = _choose_tiling(B)
    if b_padded != B:
        xb = jnp.pad(xb, ((0, b_padded - B), (0, 0)))

    cost = pl.CostEstimate(
        flops=2 * b_padded * IN_FEATURES * N_PAD,
        transcendentals=0,
        bytes_accessed=(b_padded * IN_FEATURES * 4        # x (f32, streamed once)
                        + IN_FEATURES * N_PAD * 2         # weight (bf16, resident)
                        + N_PAD * 4                       # bias (f32, resident)
                        + b_padded * N_PAD * 2),          # output (bf16)
    )

    out_pad = pl.pallas_call(
        _linear_kernel,
        out_shape=jax.ShapeDtypeStruct((b_padded, N_PAD), jnp.bfloat16),
        grid_spec=pl.GridSpec(
            grid=(num_tiles,),
            in_specs=[
                pl.BlockSpec((tb, IN_FEATURES), lambda i: (i, 0)),     # x tile streams
                pl.BlockSpec((IN_FEATURES, N_PAD), lambda i: (0, 0)),  # weight resident
                pl.BlockSpec((1, N_PAD), lambda i: (0, 0)),            # bias resident
            ],
            out_specs=pl.BlockSpec((tb, N_PAD), lambda i: (i, 0)),
        ),
        compiler_params=pltpu.CompilerParams(
            dimension_semantics=("parallel",),   # batch tiles independent -> megacore
            vmem_limit_bytes=32 * 1024 * 1024,   # f32 tiles fit v5e's scoped VMEM too
        ),
        cost_estimate=cost,
    )(xb, w_pad, b_pad)

    # TODO(synk): if logits feed a softmax/CE/argmax, fuse the consumer or read
    # the padded (b_padded, 128) bf16 layout directly instead of slicing here.
    return out_pad[:B, :OUT_FEATURES].astype(jnp.float32)


def init_params(key):
    """Deterministic init matching torch.nn.Linear(784, 10) shapes/init style."""
    k_w, k_b = jax.random.split(key)
    bound = 1.0 / jnp.sqrt(784.0)
    weight = jax.random.uniform(k_w, (10, 784), jnp.float32, -bound, bound)
    bias = jax.random.uniform(k_b, (10,), jnp.float32, -bound, bound)
    return weight, bias


if __name__ == "__main__":
    key = jax.random.PRNGKey(0)
    k_x, k_p = jax.random.split(key)

    B = 8
    x = jax.random.normal(k_x, (B, 1, 28, 28), jnp.float32)
    weight, bias = init_params(k_p)

    w_pad, b_pad = prepare_params(weight, bias)       # one-time prep
    logits = fmnist_forward(x, w_pad, b_pad)
    jax.block_until_ready(logits)

    # Reference of the same math (bf16 x/w, f32 accumulate, bf16 output).
    x_r = x.reshape(B, IN_FEATURES).astype(jnp.bfloat16).astype(jnp.float32)
    w_r = weight.astype(jnp.bfloat16).astype(jnp.float32)
    ref = (x_r @ w_r.T + bias).astype(jnp.bfloat16).astype(jnp.float32)

    assert logits.shape == (B, OUT_FEATURES)
    assert logits.dtype == jnp.float32
    assert jnp.allclose(logits, ref, atol=1e-2, rtol=1e-2), float(
        jnp.max(jnp.abs(logits - ref)))

    print("KERNEL_OK")
</pallas_src>

<mosaic_0001>
module attributes {stable_mosaic.version = 11 : i64} {
  func.func @_linear_kernel(%arg0: i32, %arg1: memref<8x784xf32, #tpu.memory_space<vmem>>, %arg2: memref<784x128xbf16, #tpu.memory_space<vmem>>, %arg3: memref<1x128xf32, #tpu.memory_space<vmem>>, %arg4: memref<8x128xbf16, #tpu.memory_space<vmem>>) attributes {dimension_semantics = [#tpu.dimension_semantics<parallel>], iteration_bounds = array<i64: 1>, scalar_prefetch = 0 : i64, scratch_operands = 0 : i64, tpu.core_type = #tpu.core_type<tc>, window_params = [{transform_indices = @transform_0, window_bounds = array<i64: 8, 784>}, {pipeline_mode = #tpu.pipeline_mode<synchronous>, transform_indices = @transform_1, window_bounds = array<i64: 784, 128>}, {pipeline_mode = #tpu.pipeline_mode<synchronous>, transform_indices = @transform_2, window_bounds = array<i64: 1, 128>}, {transform_indices = @transform_3, window_bounds = array<i64: 8, 128>}]} {
    %c0 = arith.constant 0 : index
    %c0_0 = arith.constant 0 : index
    %0 = vector.load %arg1[%c0, %c0_0] : memref<8x784xf32, #tpu.memory_space<vmem>>, vector<8x784xf32>
    %1 = arith.truncf %0 : vector<8x784xf32> to vector<8x784xbf16>
    %c0_1 = arith.constant 0 : index
    %c0_2 = arith.constant 0 : index
    %2 = vector.load %arg2[%c0_1, %c0_2] : memref<784x128xbf16, #tpu.memory_space<vmem>>, vector<784x128xbf16>
    %cst = arith.constant dense<0.000000e+00> : vector<8x128xf32>
    %3 = tpu.matmul %1, %2, %cst {dimension_numbers = #tpu.dot_dimension_numbers<[1], [0], [0], [1], [0, 0, 1, 1], [], []>} : vector<8x784xbf16>, vector<784x128xbf16>, vector<8x128xf32> -> vector<8x128xf32>
    %c0_3 = arith.constant 0 : index
    %c0_4 = arith.constant 0 : index
    %4 = vector.load %arg3[%c0_3, %c0_4] : memref<1x128xf32, #tpu.memory_space<vmem>>, vector<1x128xf32>
    %5 = vector.broadcast %4 : vector<1x128xf32> to vector<8x128xf32>
    %6 = arith.addf %3, %5 : vector<8x128xf32>
    %7 = arith.truncf %6 : vector<8x128xf32> to vector<8x128xbf16>
    %c0_5 = arith.constant 0 : index
    %c0_6 = arith.constant 0 : index
    %8 = vector.load %arg4[%c0_5, %c0_6] : memref<8x128xbf16, #tpu.memory_space<vmem>>, vector<8x128xbf16>
    tpu.vector_store %arg4[%c0_5, %c0_6], %7 {strides = array<i32>} : memref<8x128xbf16, #tpu.memory_space<vmem>>, vector<8x128xbf16>,
    return
  }
  func.func @transform_0(%arg0: i32) -> (i32, i32) {
    %c0_i32 = arith.constant 0 : i32
    %c0_i32_0 = arith.constant 0 : i32
    return %arg0, %c0_i32 : i32, i32
  }
  func.func @transform_1(%arg0: i32) -> (i32, i32) {
    %c0_i32 = arith.constant 0 : i32
    %c0_i32_0 = arith.constant 0 : i32
    %c0_i32_1 = arith.constant 0 : i32
    return %c0_i32, %c0_i32_0 : i32, i32
  }
  func.func @transform_2(%arg0: i32) -> (i32, i32) {
    %c0_i32 = arith.constant 0 : i32
    %c0_i32_0 = arith.constant 0 : i32
    %c0_i32_1 = arith.constant 0 : i32
    return %c0_i32, %c0_i32_0 : i32, i32
  }
  func.func @transform_3(%arg0: i32) -> (i32, i32) {
    %c0_i32 = arith.constant 0 : i32
    %c0_i32_0 = arith.constant 0 : i32
    return %arg0, %c0_i32 : i32, i32
  }
}

</mosaic_0001>

<bundles_post_ra>
// kernel: fmnist_forward.1
= control target key start
LH: loop header
LB: loop body
LE: loop exit
PB: predicated region body
PF: predicated region fallthrough
CT: control target
= control target key end

     0   :  { %vm425_vm0 = vcmask 130048   ;;  %s967_s1 = inlined_call_operand.vmem [shape: bf16[784,128], index: 1, kind: input, shape index: {}]   ;;  %s968_s2 = inlined_call_operand.vmem [shape: f32[1,128], index: 2, kind: input, shape index: {}]   ;;  %s969_s0 = inlined_call_operand.vmem [shape: f32[8,784], index: 0, kind: input, shape index: {}]   ;;  %s970_s3 = inlined_call_operand.vmem [shape: bf16[8,128], index: 3, kind: output, shape index: {}]  }
   0x1   :  { %v730_v0 = vld [vmem:[%s967_s1 + $0x38] sm:$0xff]  ;;  %v729_v3 = vld [vmem:[%s967_s1 + $0x30] sm:$0xff]  ;;  %v728_v8 = vld [vmem:[%s967_s1 + $0x28] sm:$0xff] }
   0x2   :  { %v738_v1 = vld [vmem:[%s967_s1 + $0x78] sm:$0xff]  ;;  %429 = vmatpush.bf16.msra.mxu0 %v730_v0  ;;  %v737_v4 = vld [vmem:[%s967_s1 + $0x70] sm:$0xff]  ;;  %v736_v9 = vld [vmem:[%s967_s1 + $0x68] sm:$0xff] }
   0x3   :  { %v746_v2 = vld [vmem:[%s967_s1 + $0xb8] sm:$0xff]  ;;  %442 = vmatpush.bf16.msra.mxu1 %v738_v1  ;;  %v745_v5 = vld [vmem:[%s967_s1 + $0xb0] sm:$0xff]  ;;  %v744_v10 = vld [vmem:[%s967_s1 + $0xa8] sm:$0xff] }
   0x4   :  { %455 = vmatpush.bf16.msra.mxu2 %v746_v2  ;;  %v754_v6 = vld [vmem:[%s967_s1 + $0xf8] sm:$0xff]  ;;  %v753_v7 = vld [vmem:[%s967_s1 + $0xf0] sm:$0xff]  ;;  %v752_v11 = vld [vmem:[%s967_s1 + $0xe8] sm:$0xff] }
   0x5   :  { %468 = vmatpush.bf16.msra.mxu3 %v754_v6  ;;  %v727_v12 = vld [vmem:[%s967_s1 + $0x20] sm:$0xff]  ;;  %v726_v16 = vld [vmem:[%s967_s1 + $0x18] sm:$0xff]  ;;  %v725_v20 = vld [vmem:[%s967_s1 + $0x10] sm:$0xff] }
   0x6   :  { %430 = vmatpush.bf16.msra.mxu0 %v729_v3  ;;  %v735_v13 = vld [vmem:[%s967_s1 + $0x60] sm:$0xff]  ;;  %v734_v17 = vld [vmem:[%s967_s1 + $0x58] sm:$0xff]  ;;  %v733_v21 = vld [vmem:[%s967_s1 + $0x50] sm:$0xff] }
   0x7   :  { %443 = vmatpush.bf16.msra.mxu1 %v737_v4  ;;  %v743_v14 = vld [vmem:[%s967_s1 + $0xa0] sm:$0xff]  ;;  %v742_v18 = vld [vmem:[%s967_s1 + $0x98] sm:$0xff]  ;;  %v741_v22 = vld [vmem:[%s967_s1 + $0x90] sm:$0xff] }
   0x8   :  { %456 = vmatpush.bf16.msra.mxu2 %v745_v5  ;;  %v751_v15 = vld [vmem:[%s967_s1 + $0xe0] sm:$0xff]  ;;  %v750_v19 = vld [vmem:[%s967_s1 + $0xd8] sm:$0xff]  ;;  %v749_v23 = vld [vmem:[%s967_s1 + $0xd0] sm:$0xff] }
   0x9   :  { %469 = vmatpush.bf16.msra.mxu3 %v753_v7  ;;  %v724_v24 = vld [vmem:[%s967_s1 + $0x8] sm:$0xff]  ;;  %v723_v27 = vld [vmem:[%s967_s1] sm:$0xff]  ;;  %v762_v33 = vld [vmem:[%s967_s1 + $0x138] sm:$0xff] }
   0xa   :  { %431 = vmatpush.bf16.msra.mxu0 %v728_v8  ;;  %v732_v25 = vld [vmem:[%s967_s1 + $0x48] sm:$0xff]  ;;  %v731_v29 = vld [vmem:[%s967_s1 + $0x40] sm:$0xff]  ;;  %v17_v34 = vld [vmem:[%s969_s0 + $0x10] sm:$0xff] }
   0xb   :  { %444 = vmatpush.bf16.msra.mxu1 %v736_v9  ;;  %v740_v26 = vld [vmem:[%s967_s1 + $0x88] sm:$0xff]  ;;  %v15_v30 = vld [vmem:[%s969_s0] sm:$0xff]  ;;  %v770_v35 = vld [vmem:[%s967_s1 + $0x178] sm:$0xff]  ;;  %v24_v39 = vpack.c.bf16 %v17_v34, %v17_v34 }
   0xc   :  { %457 = vmatpush.bf16.msra.mxu2 %v744_v10  ;;  %v748_v28 = vld [vmem:[%s967_s1 + $0xc8] sm:$0xff]  ;;  %v739_v32 = vld [vmem:[%s967_s1 + $0x80] sm:$0xff]  ;;  %v22_v37 = vpack.c.bf16 %v15_v30, %v15_v30  ;;  %v18_v41 = vld [vmem:[%s969_s0 + $0x18] sm:$0xff] }
   0xd   :  { %470 = vmatpush.bf16.msra.mxu3 %v752_v11  ;;  %v16_v31 = vld [vmem:[%s969_s0 + $0x8] sm:$0xff]  ;;  %v771_v36 = vld [vmem:[%s967_s1 + $0x180] sm:$0xff]  ;;  %v761_v42 = vld [vmem:[%s967_s1 + $0x130] sm:$0xff]  ;;  %v25_v44 = vpack.c.bf16 %v18_v41, %v18_v41 }
   0xe   :  { %432 = vmatpush.bf16.msra.mxu0 %v727_v12  ;;  %v23_v38 = vpack.c.bf16 %v16_v31, %v16_v31  ;;  %v747_v40 = vld [vmem:[%s967_s1 + $0xc0] sm:$0xff]  ;;  %v769_v43 = vld [vmem:[%s967_s1 + $0x170] sm:$0xff]  ;;  %v760_v45 = vld [vmem:[%s967_s1 + $0x128] sm:$0xff] }
   0xf   :  { %445 = vmatpush.bf16.msra.mxu1 %v735_v13  ;;  %v768_v46 = vld [vmem:[%s967_s1 + $0x168] sm:$0xff]  ;;  %v759_v47 = vld [vmem:[%s967_s1 + $0x120] sm:$0xff]  ;;  %v758_v49 = vld [vmem:[%s967_s1 + $0x118] sm:$0xff] }
  0x10   :  { %458 = vmatpush.bf16.msra.mxu2 %v743_v14  ;;  %v767_v48 = vld [vmem:[%s967_s1 + $0x160] sm:$0xff]  ;;  %v21_v50 = vld [vmem:[%s969_s0 + $0x30] sm:$0xff]  ;;  %v766_v51 = vld [vmem:[%s967_s1 + $0x158] sm:$0xff] }
  0x11   :  { %471 = vmatpush.bf16.msra.mxu3 %v751_v15  ;;  %v28_v52 = vpack.c.bf16 %v21_v50, %v21_v50  ;;  %v757_v53 = vld [vmem:[%s967_s1 + $0x110] sm:$0xff]  ;;  %v756_v55 = vld [vmem:[%s967_s1 + $0x108] sm:$0xff]  ;;  %v755_v57 = vld [vmem:[%s967_s1 + $0x100] sm:$0xff] }
  0x12   :  { %433 = vmatpush.bf16.msra.mxu0 %v726_v16  ;;  %v765_v54 = vld [vmem:[%s967_s1 + $0x150] sm:$0xff]  ;;  %v764_v56 = vld [vmem:[%s967_s1 + $0x148] sm:$0xff]  ;;  %v19_v58 = vld [vmem:[%s969_s0 + $0x20] sm:$0xff] }
  0x13   :  { %446 = vmatpush.bf16.msra.mxu1 %v734_v17  ;;  %v763_v59 = vld [vmem:[%s967_s1 + $0x140] sm:$0xff]  ;;  %v20_v60 = vld [vmem:[%s969_s0 + $0x28] sm:$0xff]  ;;  %v26_v61 = vpack.c.bf16 %v19_v58, %v19_v58 }
  0x14   :  { %459 = vmatpush.bf16.msra.mxu2 %v742_v18  ;;  %v27_v62 = vpack.c.bf16 %v20_v60, %v20_v60  ;;  %v772_v5 = vld [vmem:[%s968_s2] ss:$0 sm:$0xff] }
  0x15   :  { %472 = vmatpush.bf16.msra.mxu3 %v750_v19 }
  0x16   :  { %434 = vmatpush.bf16.msra.mxu0 %v725_v20 }
  0x17   :  { %447 = vmatpush.bf16.msra.mxu1 %v733_v21 }
  0x18   :  { %460 = vmatpush.bf16.msra.mxu2 %v741_v22 }
  0x19   :  { %473 = vmatpush.bf16.msra.mxu3 %v749_v23 }
  0x1a   :  { %435 = vmatpush.bf16.msra.mxu0 %v724_v24 }
  0x1b   :  { %448 = vmatpush.bf16.msra.mxu1 %v732_v25 }
  0x1c   :  { %461 = vmatpush.bf16.msra.mxu2 %v740_v26 }
  0x1d   :  { %474 = vmatpush.bf16.msra.mxu3 %v748_v28 }
  0x1e   :  { %436 = vmatpush.bf16.msra.mxu0 %v723_v27 }
  0x1f   :  { %449 = vmatpush.bf16.msra.mxu1 %v731_v29 }
  0x20   :  { %462 = vmatpush.bf16.msra.mxu2 %v739_v32 }
  0x21   :  { %437 = vmatmul.bf16.vlgmr.msra.gmra.mxu0 %v22_v37  ;;  %475 = vmatpush.bf16.msra.mxu3 %v747_v40 }
  0x22   :  { %481 = vmatpush.bf16.msrb.mxu0 %v762_v33  ;;  %450 = vmatmul.bf16.vlgmr.msra.gmra.mxu1 %v23_v38 }
  0x23   :  { %494 = vmatpush.bf16.msrb.mxu1 %v770_v35  ;;  %463 = vmatmul.bf16.vlgmr.msra.gmra.mxu2 %v24_v39 }
  0x24   :  { %514 = vmatpush.bf16.msrb.mxu2 %v771_v36  ;;  %476 = vmatmul.bf16.vlgmr.msra.gmra.mxu3 %v25_v44 }
  0x26   :  { %482 = vmatpush.bf16.msrb.mxu0 %v761_v42 }
  0x27   :  { %495 = vmatpush.bf16.msrb.mxu1 %v769_v43 }
  0x2a   :  { %483 = vmatpush.bf16.msrb.mxu0 %v760_v45 }
  0x2b   :  { %496 = vmatpush.bf16.msrb.mxu1 %v768_v46 }
  0x2e   :  { %484 = vmatpush.bf16.msrb.mxu0 %v759_v47 }
  0x2f   :  { %497 = vmatpush.bf16.msrb.mxu1 %v767_v48 }
  0x32   :  { %485 = vmatpush.bf16.msrb.mxu0 %v758_v49 }
  0x33   :  { %498 = vmatpush.bf16.msrb.mxu1 %v766_v51  ;;  %722 = vmatmul.msk.bf16.vlgmr.msrb.gmra.mxu2 %vm425_vm0, %v28_v52 }
  0x36   :  { %486 = vmatpush.bf16.msrb.mxu0 %v757_v53 }
  0x37   :  { %499 = vmatpush.bf16.msrb.mxu1 %v765_v54 }
  0x3a   :  { %487 = vmatpush.bf16.msrb.mxu0 %v756_v55 }
  0x3b   :  { %500 = vmatpush.bf16.msrb.mxu1 %v764_v56 }
  0x3e   :  { %488 = vmatpush.bf16.msrb.mxu0 %v755_v57 }
  0x3f   :  { %501 = vmatpush.bf16.msrb.mxu1 %v763_v59 }
  0x41   :  { %489 = vmatmul.bf16.vlgmr.msrb.gmra.mxu0 %v26_v61 }
  0x42   :  { %502 = vmatmul.bf16.vlgmr.msrb.gmra.mxu1 %v27_v62 }
  0x9e   :  { %v438_v63 = vpop.f32.mrf.mxu0 }
  0x9f   :  { %v451_v0 = vpop.f32.mrf.mxu1  ;;  %v439_v7 = vadd.f32 %v772_v5, %v438_v63 }
  0xa1   :  { %v452_v9 = vadd.f32 %v451_v0, %v439_v7 }
  0xa6   :  { %v464_v1 = vpop.f32.mrf.mxu2  ;;  %v440_v2 = vpop.f32.mrf.mxu0 }
  0xa7   :  { %v453_v3 = vpop.f32.mrf.mxu1  ;;  %v477_v4 = vpop.f32.mrf.mxu3  ;;  %v465_v11 = vadd.f32 %v464_v1, %v452_v9 }
  0xa9   :  { %v478_v12 = vadd.f32 %v477_v4, %v465_v11 }
  0xae   :  { %v466_v6 = vpop.f32.mrf.mxu2 }
  0xaf   :  { %v479_v8 = vpop.f32.mrf.mxu3 }
  0xb6   :  { %v516_v10 = vpop.f32.mrf.mxu2 }
  0xbe   :  { %v490_v13 = vpop.f32.mrf.mxu0  ;;  %v518_v16 = vpop.f32.mrf.mxu2 }
  0xbf   :  { %v491_v14 = vadd.f32 %v490_v13, %v478_v12  ;;  %v503_v15 = vpop.f32.mrf.mxu1 }
  0xc1   :  { %v504_v17 = vadd.f32 %v503_v15, %v491_v14 }
  0xc3   :  { %v517_v18 = vadd.f32 %v516_v10, %v504_v17 }
  0xc5   :  { %v520_v19 = vpack.c.bf16 %v517_v18, %v517_v18 }
  0xc6   :  { %v492_v20 = vpop.f32.mrf.mxu0 }
  0xc7   :  { %521 = vst [vmem:[%s970_s3] sm:$0xf] %v520_v19  ;;  %v505_v21 = vpop.f32.mrf.mxu1 }

</bundles_post_ra>
